<compile_context>
chip_gen: v7x
topology: tpu7x:2x2x1
jax: 0.10.0
libtpu: 0.0.40
codegen_flags: <defaults>
</compile_context>

<pallas_src>
import jax
import jax.numpy as jnp
from jax.experimental import pallas as pl
from jax.experimental.pallas import tpu as pltpu

_LANE = 128


def _round_up(x, m):
    return (x + m - 1) // m * m


def _se_sa_kernel(x_ref, w1_ref, b1_ref, w2_ref, b2_ref, o_ref):
    # x_ref: (tile_m, Gw)   w1_ref: (Gw, Gr)   b1_ref: (1, Gr)
    # w2_ref: (Gr, Gw)      b2_ref: (1, Gw)    o_ref: (tile_m, Gw)
    x = x_ref[...]                                     # native I/O dtype

    # fc1 + ReLU (block-diagonal weights == per-packed-row Linear).
    # Operands stay in the I/O dtype (native bf16 MXU path when applicable);
    # accumulation is f32.
    h = jnp.dot(x, w1_ref[...], preferred_element_type=jnp.float32)
    h = jnp.maximum(h + b1_ref[...], 0.0)

    # fc2 + sigmoid (cast h back to the operand dtype; no-op for f32 I/O).
    g = jnp.dot(h.astype(w2_ref.dtype), w2_ref[...],
                preferred_element_type=jnp.float32)
    g = jax.nn.sigmoid(g + b2_ref[...])

    # Gate in f32, single cast at the store.
    o_ref[...] = (x.astype(jnp.float32) * g).astype(o_ref.dtype)


def channel_se_layer_sa(x, w1, b1, w2, b2, *, tile_m=None):
    """x: (B, C, H, Wc) with Wc == num_channels.  w1: (Wc, Cr), w2: (Cr, Wc)
    (pre-transposed, row-major), b1: (Cr,), b2: (Wc,).  Returns x's shape/dtype."""
    B, C, H, Wc = x.shape
    Cr = w1.shape[1]
    assert w1.shape == (Wc, Cr) and w2.shape == (Cr, Wc)
    assert b1.shape == (Cr,) and b2.shape == (Wc,)

    # Pack G rows per vector row so the lane axis is (close to) 128-dense.
    # NOTE: fully lane-dense only when Wc divides 128; other values are still
    # correct, just not 128-dense.
    G = max(1, _LANE // Wc)
    Gw, Gr = G * Wc, G * Cr

    M = B * C * H
    M_g = _round_up(M, G)                              # rows after G-packing pad
    Mp = M_g // G                                      # packed rows

    x2d = x.reshape(M, Wc)
    if M_g != M:
        # Rare path: only pad to a multiple of G (<= G-1 extra rows).
        # TODO(synk): avoid this whole-array copy via allow_input_fusion or a
        # dedicated remainder kernel when M % G != 0 matters for perf.
        x2d = jnp.pad(x2d, ((0, M_g - M), (0, 0)))
    xp = x2d.reshape(Mp, Gw)                           # contiguous (free) reshape

    # Block-diagonal weights / tiled biases, built once outside the kernel.
    # Weights in x.dtype (native MXU path for bf16 I/O); biases in f32 since
    # they add onto f32 accumulators.
    eye = jnp.eye(G, dtype=jnp.float32)
    w1_bd = jnp.kron(eye, w1.astype(jnp.float32)).astype(x.dtype)   # (Gw, Gr)
    w2_bd = jnp.kron(eye, w2.astype(jnp.float32)).astype(x.dtype)   # (Gr, Gw)
    b1_bd = jnp.tile(b1.astype(jnp.float32), G).reshape(1, Gr)
    b2_bd = jnp.tile(b2.astype(jnp.float32), G).reshape(1, Gw)

    # ---- Tile selection (dtype-aware, VMEM-safe on v5e/v6e/v7x) ----
    itemsize = jnp.dtype(x.dtype).itemsize
    sub = 8 if itemsize >= 4 else (16 if itemsize == 2 else 32)  # sublane pack
    if tile_m is None:
        tile_m = 4096 if itemsize >= 4 else 8192       # ~2 MiB HBM tile
    # v7x megacore: keep >= 2 grid steps whenever there is enough work to split.
    if Mp > sub:
        tile_m = min(tile_m, _round_up(pl.cdiv(Mp, 2), sub))
    if tile_m >= Mp:
        tile_m = Mp                                    # single full-extent block
    grid = (pl.cdiv(Mp, tile_m),)                      # ragged last block is OK

    cost = pl.CostEstimate(
        flops=4 * M * Wc * Cr,                         # two (Wc x Cr) matmuls / row
        transcendentals=M * Wc,                        # sigmoid
        bytes_accessed=2 * M * Wc * itemsize
        + itemsize * (w1_bd.size + w2_bd.size)
        + 4 * (b1_bd.size + b2_bd.size),
    )

    outp = pl.pallas_call(
        _se_sa_kernel,
        out_shape=jax.ShapeDtypeStruct((Mp, Gw), x.dtype),
        grid_spec=pltpu.PrefetchScalarGridSpec(
            num_scalar_prefetch=0,
            grid=grid,
            in_specs=[
                pl.BlockSpec((tile_m, Gw), lambda i: (i, 0)),   # packed x rows
                pl.BlockSpec((Gw, Gr), lambda i: (0, 0)),       # w1 block-diag (resident)
                pl.BlockSpec((1, Gr), lambda i: (0, 0)),        # b1
                pl.BlockSpec((Gr, Gw), lambda i: (0, 0)),       # w2 block-diag (resident)
                pl.BlockSpec((1, Gw), lambda i: (0, 0)),        # b2
            ],
            out_specs=pl.BlockSpec((tile_m, Gw), lambda i: (i, 0)),
        ),
        compiler_params=pltpu.CompilerParams(
            dimension_semantics=("parallel",)),
        cost_estimate=cost,
    )(xp, w1_bd, b1_bd, w2_bd, b2_bd)

    out2d = outp.reshape(M_g, Wc)
    if M_g != M:
        out2d = out2d[:M]
    return out2d.reshape(B, C, H, Wc)


def _reference(x, w1, b1, w2, b2):
    xf = x.astype(jnp.float32)
    h = jnp.maximum(xf @ w1.astype(jnp.float32) + b1.astype(jnp.float32), 0.0)
    g = jax.nn.sigmoid(h @ w2.astype(jnp.float32) + b2.astype(jnp.float32))
    return (xf * g).astype(x.dtype)


if __name__ == "__main__":
    # Module config: num_channels = 16, reduction_ratio = 2 -> reduced = 8.
    num_channels = 16
    reduction_ratio = 2
    num_channels_reduced = num_channels // reduction_ratio

    # Input: (B, C, H, Wc) with Wc == num_channels (required by the PyTorch
    # module since nn.Linear acts on the last axis).
    B, Cdim, H = 2, 4, 16
    key = jax.random.PRNGKey(0)
    kx, kw1, kb1, kw2, kb2 = jax.random.split(key, 5)

    x = jax.random.normal(kx, (B, Cdim, H, num_channels), dtype=jnp.float32)

    # Deterministic parameter init, PyTorch nn.Linear-style uniform bounds.
    bound1 = 1.0 / (num_channels ** 0.5)
    w1 = jax.random.uniform(kw1, (num_channels, num_channels_reduced),
                            minval=-bound1, maxval=bound1, dtype=jnp.float32)
    b1 = jax.random.uniform(kb1, (num_channels_reduced,),
                            minval=-bound1, maxval=bound1, dtype=jnp.float32)

    bound2 = 1.0 / (num_channels_reduced ** 0.5)
    w2 = jax.random.uniform(kw2, (num_channels_reduced, num_channels),
                            minval=-bound2, maxval=bound2, dtype=jnp.float32)
    b2 = jax.random.uniform(kb2, (num_channels,),
                            minval=-bound2, maxval=bound2, dtype=jnp.float32)

    out = channel_se_layer_sa(x, w1, b1, w2, b2)
    out = jax.block_until_ready(out)

    ref = _reference(x, w1, b1, w2, b2)
    assert out.shape == x.shape and out.dtype == x.dtype
    assert jnp.allclose(out, ref, atol=1e-5, rtol=1e-5)

    print("KERNEL_OK")
</pallas_src>

<mosaic_0001>
module attributes {stable_mosaic.version = 11 : i64} {
  func.func @_se_sa_kernel(%arg0: i32, %arg1: memref<8x128xf32, #tpu.memory_space<vmem>>, %arg2: memref<128x64xf32, #tpu.memory_space<vmem>>, %arg3: memref<1x64xf32, #tpu.memory_space<vmem>>, %arg4: memref<64x128xf32, #tpu.memory_space<vmem>>, %arg5: memref<1x128xf32, #tpu.memory_space<vmem>>, %arg6: memref<8x128xf32, #tpu.memory_space<vmem>>) attributes {dimension_semantics = [#tpu.dimension_semantics<parallel>], iteration_bounds = array<i64: 2>, scalar_prefetch = 0 : i64, scratch_operands = 0 : i64, tpu.core_type = #tpu.core_type<tc>, window_params = [{transform_indices = @transform_0, window_bounds = array<i64: 8, 128>}, {pipeline_mode = #tpu.pipeline_mode<synchronous>, transform_indices = @transform_1, window_bounds = array<i64: 128, 64>}, {pipeline_mode = #tpu.pipeline_mode<synchronous>, transform_indices = @transform_2, window_bounds = array<i64: 1, 64>}, {pipeline_mode = #tpu.pipeline_mode<synchronous>, transform_indices = @transform_3, window_bounds = array<i64: 64, 128>}, {pipeline_mode = #tpu.pipeline_mode<synchronous>, transform_indices = @transform_4, window_bounds = array<i64: 1, 128>}, {transform_indices = @transform_5, window_bounds = array<i64: 8, 128>}]} {
    %c0 = arith.constant 0 : index
    %c0_0 = arith.constant 0 : index
    %0 = vector.load %arg1[%c0, %c0_0] : memref<8x128xf32, #tpu.memory_space<vmem>>, vector<8x128xf32>
    %c0_1 = arith.constant 0 : index
    %c0_2 = arith.constant 0 : index
    %1 = vector.load %arg2[%c0_1, %c0_2] : memref<128x64xf32, #tpu.memory_space<vmem>>, vector<128x64xf32>
    %cst = arith.constant dense<0.000000e+00> : vector<8x64xf32>
    %2 = tpu.matmul %0, %1, %cst {dimension_numbers = #tpu.dot_dimension_numbers<[1], [0], [0], [1], [0, 0, 1, 1], [], []>} : vector<8x128xf32>, vector<128x64xf32>, vector<8x64xf32> -> vector<8x64xf32>
    %c0_3 = arith.constant 0 : index
    %c0_4 = arith.constant 0 : index
    %3 = vector.load %arg3[%c0_3, %c0_4] : memref<1x64xf32, #tpu.memory_space<vmem>>, vector<1x64xf32>
    %4 = vector.broadcast %3 : vector<1x64xf32> to vector<8x64xf32>
    %5 = arith.addf %2, %4 : vector<8x64xf32>
    %cst_5 = arith.constant 0.000000e+00 : f32
    %6 = vector.broadcast %cst_5 : f32 to vector<8x64xf32>
    %7 = arith.maximumf %5, %6 : vector<8x64xf32>
    %c0_6 = arith.constant 0 : index
    %c0_7 = arith.constant 0 : index
    %8 = vector.load %arg4[%c0_6, %c0_7] : memref<64x128xf32, #tpu.memory_space<vmem>>, vector<64x128xf32>
    %cst_8 = arith.constant dense<0.000000e+00> : vector<8x128xf32>
    %9 = tpu.matmul %7, %8, %cst_8 {dimension_numbers = #tpu.dot_dimension_numbers<[1], [0], [0], [1], [0, 0, 1, 1], [], []>} : vector<8x64xf32>, vector<64x128xf32>, vector<8x128xf32> -> vector<8x128xf32>
    %c0_9 = arith.constant 0 : index
    %c0_10 = arith.constant 0 : index
    %10 = vector.load %arg5[%c0_9, %c0_10] : memref<1x128xf32, #tpu.memory_space<vmem>>, vector<1x128xf32>
    %11 = vector.broadcast %10 : vector<1x128xf32> to vector<8x128xf32>
    %12 = arith.addf %9, %11 : vector<8x128xf32>
    %13 = arith.negf %12 : vector<8x128xf32>
    %14 = math.exp %13 : vector<8x128xf32>
    %cst_11 = arith.constant 1.000000e+00 : f32
    %15 = vector.broadcast %cst_11 : f32 to vector<8x128xf32>
    %16 = arith.addf %15, %14 : vector<8x128xf32>
    %17 = arith.divf %15, %16 : vector<8x128xf32>
    %18 = arith.mulf %0, %17 : vector<8x128xf32>
    %c0_12 = arith.constant 0 : index
    %c0_13 = arith.constant 0 : index
    %19 = vector.load %arg6[%c0_12, %c0_13] : memref<8x128xf32, #tpu.memory_space<vmem>>, vector<8x128xf32>
    tpu.vector_store %arg6[%c0_12, %c0_13], %18 {strides = array<i32>} : memref<8x128xf32, #tpu.memory_space<vmem>>, vector<8x128xf32>,
    return
  }
  func.func @transform_0(%arg0: i32) -> (i32, i32) {
    %c0_i32 = arith.constant 0 : i32
    %c0_i32_0 = arith.constant 0 : i32
    return %arg0, %c0_i32 : i32, i32
  }
  func.func @transform_1(%arg0: i32) -> (i32, i32) {
    %c0_i32 = arith.constant 0 : i32
    %c0_i32_0 = arith.constant 0 : i32
    %c0_i32_1 = arith.constant 0 : i32
    return %c0_i32, %c0_i32_0 : i32, i32
  }
  func.func @transform_2(%arg0: i32) -> (i32, i32) {
    %c0_i32 = arith.constant 0 : i32
    %c0_i32_0 = arith.constant 0 : i32
    %c0_i32_1 = arith.constant 0 : i32
    return %c0_i32, %c0_i32_0 : i32, i32
  }
  func.func @transform_3(%arg0: i32) -> (i32, i32) {
    %c0_i32 = arith.constant 0 : i32
    %c0_i32_0 = arith.constant 0 : i32
    %c0_i32_1 = arith.constant 0 : i32
    return %c0_i32, %c0_i32_0 : i32, i32
  }
  func.func @transform_4(%arg0: i32) -> (i32, i32) {
    %c0_i32 = arith.constant 0 : i32
    %c0_i32_0 = arith.constant 0 : i32
    %c0_i32_1 = arith.constant 0 : i32
    return %c0_i32, %c0_i32_0 : i32, i32
  }
  func.func @transform_5(%arg0: i32) -> (i32, i32) {
    %c0_i32 = arith.constant 0 : i32
    %c0_i32_0 = arith.constant 0 : i32
    return %arg0, %c0_i32 : i32, i32
  }
}

</mosaic_0001>

<bundles_post_ra>
// kernel: tpu_custom_call.1
= control target key start
LH: loop header
LB: loop body
LE: loop exit
PB: predicated region body
PF: predicated region fallthrough
CT: control target
= control target key end

     0   :  { %10 = vsyncpa [#allocation3], 0  ;;  %s937_s0 = inlined_call_operand.vmem [shape: f32[16,128], index: 0, kind: input, shape index: {}]   ;;  %s938_s1 = inlined_call_operand.vmem [shape: f32[128,64], index: 1, kind: input, shape index: {}]   ;;  %s939_s2 = inlined_call_operand.vmem [shape: f32[1,64], index: 2, kind: input, shape index: {}]   ;;  %s940_s3 = inlined_call_operand.vmem [shape: f32[64,128], index: 3, kind: input, shape index: {}]   ;;  %s941_s4 = inlined_call_operand.vmem [shape: f32[1,128], index: 4, kind: input, shape index: {}]   ;;  %s942_s5 = inlined_call_operand.hbm [shape: f32[16,128], index: 5, kind: output, shape index: {}]  }
   0x1   :  { %12 = vsyncpa [#allocation3 + $0x1], 0  ;;  %s759_s18 = smov 0   ;;  %s761_s19 = smov 0  }
   0x2   :  { %s763_s20 = smov 0   ;;  %s765_s21 = smov 0  }
   0x3 LB: > { %s780_s22 = sadd.s32 4294967295, %s723_s21   ;;  %s485_s23 = sadd.s32 4294967294, %s723_s21   ;;  %s723_s21 = sphi %s765_s21, %s948_s21   ;;  %s719_s20 = sphi %s763_s20, %s947_s20   ;;  %s715_s19 = sphi %s761_s19, %s946_s19   ;;  %s711_s18 = sphi %s759_s18, %s945_s18  }
   0x4   : > { %s784_s24 = sadd.s32 1, %s723_s21   ;;  %s135_s25 = sadd.s32 1, %s719_s20 }
   0x5   : > { %s132_s26 = ssub.s32 %s723_s21, %s784_s24  ;;  %p145_p0 = scmp.ne.s32.totalorder %s719_s20, %s715_s19 }
   0x6   : > { %p133_p1 = scmp.eq.s32.totalorder %s132_s26, 0  ;;  %p146_p2 = scmp.eq.s32.totalorder %s780_s22, 1 }
   0x7   : > { %p151_p3 = scmp.ne.s32.totalorder %s715_s19, %s711_s18  ;;  %p152_p4 = scmp.eq.s32.totalorder %s485_s23, 1 }
   0x8   : > { %s795_s27 = scalar_select %p133_p1, %s719_s20, %s135_s25  }
   0x9   : > { %p797_p5 = por %p146_p2, %p145_p0  ;;  %p801_p6 = por %p152_p4, %p151_p3 }
   0xa   : > { %p488_p7 = scmp.ge.s32.totalorder %s723_s21, 1  ;;  %p189_p8 = scmp.lt.s32.totalorder %s723_s21, 3 }
   0xc   : > { %p190_p9 = pnand %p488_p7, %p189_p8 }
   0xd   : > { %v221_v0 = vld [vmem:[%s938_s1] sm:$0xff] (!%p190_p9)  ;;  %v222_v1 = vld [vmem:[%s938_s1 + $0x8] sm:$0xff] (!%p190_p9)  ;;  %v223_v2 = vld [vmem:[%s938_s1 + $0x10] sm:$0xff] (!%p190_p9)  ;;  %v725_v3 = vmov (!%p190_p9), 0.0|0.0   ;;  %vm726_vm0 = vmmov (!%p190_p9), 0   ;;  %v727_v6 = vmov (!%p190_p9), 0.0  }
   0xe   : > { %193 = sbr.rel (%p190_p9) target bundleno = 519 (0x207), region = 40  ;;  %579 = vmatprep.subr.bf16.mxu0 (!%p190_p9), %v725_v3  ;;  %v580_v4 = vpack.c.bf16 (!%p190_p9), %v222_v1, %v221_v0  ;;  %v224_v5 = vld [vmem:[%s938_s1 + $0x18] sm:$0xff] (!%p190_p9)  ;;  %557 = vmatprep.mubr.msk.f32.mxu0 (!%p190_p9), %vm726_vm0, %v727_v6  ;;  %v225_v8 = vld [vmem:[%s938_s1 + $0x20] sm:$0xff] (!%p190_p9)  ;;  %v226_v9 = vld [vmem:[%s938_s1 + $0x28] sm:$0xff] (!%p190_p9)  ;;  %p216_p10 = scmp.lt.s32.totalorder (!%p190_p9), %s780_s22, 1  ;;  %vm330_vm1 = vcmask (!%p190_p9), 523264  }
   0xf   : > { %603 = vmatprep.subr.bf16.mxu1 (!%p190_p9), %v725_v3  ;;  %576 = vmatprep.mubr.msk.f32.mxu1 (!%p190_p9), %vm726_vm0, %v727_v6  ;;  %v583_v7 = vpack.c.bf16 (!%p190_p9), %v224_v5, %v223_v2  ;;  %v315_v10 = vld [vmem:[%s940_s3] sm:$0xff] (!%p190_p9)  ;;  %v316_v11 = vld [vmem:[%s940_s3 + $0x8] sm:$0xff] (!%p190_p9)  ;;  %v317_v13 = vld [vmem:[%s940_s3 + $0x10] sm:$0xff] (!%p190_p9)  ;;  %v586_v15 = vpack.c.bf16 (!%p190_p9), %v226_v9, %v225_v8  ;;  %s213_s14 = sand.u32 (!%p190_p9), 1, %s715_s19   ;;  %s496_s16 = sshll.u32 (!%p190_p9), %s780_s22, 7 }
  0x10   : > { %581 = vmatpush3.bf16.msra.mxu0 (!%p190_p9), %v580_v4  ;;  %v604_v12 = vpack.c.bf16 (!%p190_p9), %v316_v11, %v315_v10  ;;  %v318_v14 = vld [vmem:[%s940_s3 + $0x18] sm:$0xff] (!%p190_p9)  ;;  %v227_v16 = vld [vmem:[%s938_s1 + $0x30] sm:$0xff] (!%p190_p9)  ;;  %v319_v19 = vld [vmem:[%s940_s3 + $0x20] sm:$0xff] (!%p190_p9)  ;;  %s489_s15 = sshll.u32 (!%p190_p9), %s213_s14, 3  ;;  %s413_s6 = scalar_lea.sflag (!%p190_p9), [#allocation3], %s213_s14 }
  0x11   : > { %582 = vmatprep.subr.bf16.mxu0 (!%p190_p9), %v725_v3  ;;  %v228_v17 = vld [vmem:[%s938_s1 + $0x38] sm:$0xff] (!%p190_p9)  ;;  %v607_v18 = vpack.c.bf16 (!%p190_p9), %v318_v14, %v317_v13  ;;  %v320_v20 = vld [vmem:[%s940_s3 + $0x28] sm:$0xff] (!%p190_p9)  ;;  %v229_v22 = vld [vmem:[%s938_s1 + $0x40] sm:$0xff] (!%p190_p9)  ;;  %s215_s17 = scalar_lea.vmem (!%p190_p9), [#allocation2], %s489_s15 }
  0x12   : > { %605 = vmatpush3.bf16.msra.mxu1 (!%p190_p9), %v604_v12  ;;  %v589_v21 = vpack.c.bf16 (!%p190_p9), %v228_v17, %v227_v16  ;;  %v230_v23 = vld [vmem:[%s938_s1 + $0x48] sm:$0xff] (!%p190_p9)  ;;  %v610_v24 = vpack.c.bf16 (!%p190_p9), %v320_v20, %v319_v19  ;;  %v231_v26 = vld [vmem:[%s938_s1 + $0x50] sm:$0xff] (!%p190_p9)  ;;  %v232_v27 = vld [vmem:[%s938_s1 + $0x58] sm:$0xff] (!%p190_p9) }
  0x13   : > { %606 = vmatprep.subr.bf16.mxu1 (!%p190_p9), %v725_v3  ;;  %v592_v25 = vpack.c.bf16 (!%p190_p9), %v230_v23, %v229_v22  ;;  %v595_v28 = vpack.c.bf16 (!%p190_p9), %v232_v27, %v231_v26  ;;  %v233_v29 = vld [vmem:[%s938_s1 + $0x60] sm:$0xff] (!%p190_p9)  ;;  %v234_v30 = vld [vmem:[%s938_s1 + $0x68] sm:$0xff] (!%p190_p9)  ;;  %v235_v32 = vld [vmem:[%s938_s1 + $0x70] sm:$0xff] (!%p190_p9) }
  0x14   : > { %584 = vmatpush3.bf16.msra.mxu0 (!%p190_p9), %v583_v7  ;;  %v598_v31 = vpack.c.bf16 (!%p190_p9), %v234_v30, %v233_v29  ;;  %v236_v33 = vld [vmem:[%s938_s1 + $0x78] sm:$0xff] (!%p190_p9)  ;;  %v321_v36 = vld [vmem:[%s940_s3 + $0x30] sm:$0xff] (!%p190_p9)  ;;  %v491_v39 = vld [vmem:[%s939_s2] ss:$0 sm:$0xff] (!%p190_p9) }
  0x15   : > { %585 = vmatprep.subr.bf16.mxu0 %v725_v3  ;;  %s217_s13 = scalar_select %p216_p10, %s780_s22, 1  ;;  %v601_v34 = vpack.c.bf16 %v236_v33, %v235_v32  ;;  %v322_v37 = vld [vmem:[%s940_s3 + $0x38] sm:$0xff]  ;;  %v492_v44 = vld [vmem:[%s941_s4] ss:$0 sm:$0xff] }
  0x16   : > { %608 = vmatpush3.bf16.msra.mxu1 %v607_v18  ;;  %v613_v38 = vpack.c.bf16 %v322_v37, %v321_v36  ;;  %s728_s22 = smov [#allocation2]  }
  0x17   : > { %609 = vmatprep.subr.bf16.mxu1 %v725_v3  ;;  %s490_s23 = sshll.u32 %s217_s13, 3  ;;  %s665_s8 = sshll.u32 %s728_s22, 4  ;;  %s666_s8 = int_to_ptr.vmem [resolvable:$false] %s665_s8 }
  0x18   : > { %587 = vmatpush3.bf16.msra.mxu0 %v586_v15  ;;  %s219_s30 = scalar_lea.vmem %s937_s0, %s490_s23  ;;  %s426_s23 = sshll.u32 %s215_s17, 4  ;;  %s897_s23 = int_to_ptr.vmem [resolvable:$true] %s426_s23 }
  0x19   : > { %588 = vmatprep.subr.bf16.mxu0 %v725_v3  ;;  %v220_v35 = vld [vmem:[%s219_s30] sm:$0xff]  ;;  %s895_s30 = scalar_lea.hbm %s942_s5, %s496_s16  ;;  %s661_s7 = scalar_lea.vmem %s897_s23, 128 }
  0x1a   : > { %611 = vmatpush3.bf16.msra.mxu1 %v610_v24  ;;  %p662_p11 = scmp.ne.s32.totalorder %s897_s23, %s661_s7  ;;  %s667_s9 = scalar_lea.vmem %s666_s8, 256 }
  0x1b   : > { %612 = vmatprep.subr.bf16.mxu1 %v725_v3  ;;  %p668_p0 = scmp.lt.s32.totalorder %s897_s23, %s666_s8  ;;  %p669_p1 = scmp.lt.s32.totalorder %s667_s9, %s661_s7 }
  0x1c   : > { %590 = vmatpush3.bf16.msra.mxu0 %v589_v21  ;;  %p663_p12 = pnand %p662_p11, %p797_p5 }
  0x1d   : > { %591 = vmatprep.subr.bf16.mxu0 %v725_v3  ;;  %p670_p2 = por %p669_p1, %p668_p0 }
  0x1e   : > { %614 = vmatpush3.bf16.msra.mxu1 %v613_v38  ;;  %p664_p13 = pneg %p663_p12 }
  0x20   : > { %593 = vmatpush3.bf16.msra.mxu0 %v592_v25  ;;  %p671_p3 = pnand %p670_p2, %p664_p13 }
  0x21   : > { %594 = vmatprep.subr.bf16.mxu0 %v725_v3 }
  0x24   : > { %596 = vmatpush3.bf16.msra.mxu0 %v595_v28 }
  0x25   : > { %597 = vmatprep.subr.bf16.mxu0 %v725_v3 }
  0x28   : > { %599 = vmatpush3.bf16.msra.mxu0 %v598_v31 }
  0x29   : > { %600 = vmatprep.subr.bf16.mxu0 %v725_v3 }
  0x2c   : > { %602 = vmatpush3.bf16.msra.mxu0 %v601_v34 }
  0x2f   : > { %558 = vmatmul.mubr.f32.vlgmr.msra.gmra.mrb[0].mxu0 %v220_v35 }
 0x102   : > { %v310_v40 = vpop.f32.mrb[0].mxu0 }
 0x103   : > { %v311_v41 = vadd.f32 %v491_v39, %v310_v40  ;;  %v559_v42 = vpop.f32.mrb[1].mxu0 }
 0x105   : > { %v314_v43 = vmax.f32 %v311_v41, 0.0 }
 0x107   : > { %577 = vmatmul.mubr.msk.f32.vlgmr.msra.gmra.mrb[0].mxu1 %vm330_vm1, %v314_v43 }
 0x1da   : > { %v400_v45 = vpop.f32.mrb[0].mxu1 }
 0x1db   : > { %v401_v46 = vadd.f32 %v492_v44, %v400_v45  ;;  %v578_v47 = vpop.f32.mrb[1].mxu1 }
 0x1dd   : > { %v494_v48 = vmul.f32 -1.442695, %v401_v46 }
 0x1df   : > { %657 = vpow2.f32 %v494_v48 }
 0x1e9   : > { %v658_v49 = vpop.eup %657 }
 0x1ea   : > { %v407_v50 = vadd.f32 1.0, %v658_v49 }
 0x1ec   : > { %659 = vrcp.f32 %v407_v50 }
 0x1f6   : > { %v660_v51 = vpop.eup %659 }
 0x1f7   : > { %v410_v52 = vmul.f32 %v660_v51, %v220_v35 }
 0x1f9   : > { %411 = vst [vmem:[%s215_s17] sm:$0xff] %v410_v52 }
 0x1fa   : > { %674 = shalt.err (!%p671_p3)
}
 0x1fb   : > { %s675_s10 = scalar_lea.hbm %s895_s30, 128  ;;  %s679_s13 = scalar_lea.hbm %s942_s5, 256 }
 0x1fc   : > { %p676_p4 = scmp.ne.s32.totalorder %s895_s30, %s675_s10  ;;  %p680_p9 = scmp.lt.u32.totalorder %s895_s30, %s942_s5 }
 0x1fd   : > { %p681_p10 = scmp.lt.u32.totalorder %s679_s13, %s675_s10  ;;  %p683_p12 = scmp.lt.u32.totalorder %s675_s10, %s895_s30 }
 0x1fe   : > { %p677_p7 = pnand %p676_p4, %p797_p5 }
 0x1ff   : > { %p682_p11 = por %p681_p10, %p680_p9 }
 0x200   : > { %p678_p8 = pneg %p677_p7 }
 0x201   : > { %p684_p13 = por %p683_p12, %p682_p11 }
 0x203   : > { %p685_p0 = pnand %p684_p13, %p678_p8 }
 0x205   : > { %688 = shalt.err (!%p685_p0)
}
 0x206   : > { %615 = dma.vmem_to_hbm [thread:$0]  (%p797_p5), %s897_s23, 128, %s895_s30, %s413_s6  }
 0x207 PF: > { %p621_p1 = scmp.ge.s32.totalorder %s723_s21, 2  ;;  %s438_s16 = sand.u32 1, %s711_s18  }
 0x208   : > { %s439_s17 = scalar_lea.sflag [#allocation3], %s438_s16 }
 0x209   : > { %p618_p2 = pnand %p621_p1, %p801_p6 }
 0x20b   : > { %706 = dma.done.wait (!%p618_p2), %s439_s17, 128  }
 0x20c   : > { %708 = vsyncadd (!%p618_p2), %s439_s17, 4294967168  ;;  %p15_p3 = scmp.ge.s32.totalorder %s784_s24, 4   ;;  %s945_s18 = smov %s715_s19 }
 0x20d   : > { %s946_s19 = smov %s719_s20  ;;  %s947_s20 = smov %s795_s27 }
 0x20e   : > { %s948_s21 = smov %s784_s24  ;;  %17 = sbr.rel (!%p15_p3) target bundleno = 3 (0x3), region = 75 }
 0x215   :  { %444 = vsyncpa [#allocation3], 1 }
 0x216   :  { %446 = vsyncpa [#allocation3 + $0x1], 1 }

</bundles_post_ra>
